<compile_context>
chip_gen: v7x
topology: tpu7x:2x2x1
jax: 0.10.0
libtpu: 0.0.40
codegen_flags: <defaults>
</compile_context>

<pallas_src>
import functools

import jax
import jax.numpy as jnp
from jax.experimental import pallas as pl
from jax.experimental.pallas import tpu as pltpu

_SUBLANES = 8    # vreg sublane count (second-to-last dim granularity)


def _round_up(x, m):
    return ((x + m - 1) // m) * m


def _choose_batch_tile(batch, block_b):
    """Pick a sublane-multiple batch tile with an even (balanced) step count."""
    cap = max(_SUBLANES, min(block_b, _round_up(batch, _SUBLANES)))
    cap = _round_up(cap, _SUBLANES)
    steps = -(-batch // cap)                      # cdiv
    if steps > 1 and steps % 2 == 1:
        steps += 1                                # even steps -> balanced TCs on v7x
    tb = _round_up(-(-batch // steps), _SUBLANES)
    return tb


def _linear_sigmoid_kernel(x_ref, w_ref, b_ref, o_ref, *, approx_recip):
    # x_ref : (TB, In)   VMEM (per-step tile, double-buffered by Pallas)
    # w_ref : (In, Out)  VMEM (resident; transposed once in the wrapper)
    # b_ref : (1, Out)   VMEM (resident)
    # o_ref : (TB, Out)  VMEM (compact: last dim == full array dim)
    z = jnp.dot(x_ref[...], w_ref[...], preferred_element_type=jnp.float32)
    z = z + b_ref[...]                              # broadcast (1, Out) over rows
    # sigmoid(z) = 1 / (1 + exp(-z)); exp issues on the EUP.  With
    # approx_recip=True the reciprocal also lands on the (otherwise idle) EUP.
    e = jnp.exp(-z)
    o_ref[...] = pl.reciprocal(1.0 + e, approx=approx_recip).astype(o_ref.dtype)


def evaluation_model_forward(x, weight, bias, *, block_b=1024,
                             compute_dtype=None, approx_sigmoid=False,
                             xla_fallback_batch=0):
    """sigmoid(x @ weight.T + bias).

    x: (B, In) f32; weight: (Out, In) f32 (PyTorch nn.Linear layout);
    bias: (Out,) f32  ->  (B, Out) f32.

    compute_dtype: optionally cast x/weight (jnp.bfloat16 is MXU-native on
        v5e/v6e/v7x and halves operand HBM traffic); accumulation and the
        sigmoid epilogue stay f32.
    approx_sigmoid: use the EUP approximate reciprocal in the epilogue
        (roughly 1e-3-level error; not suitable for 1e-5 tolerance checks).
    xla_fallback_batch: if B is below this threshold, skip Pallas entirely and
        emit a plain fused XLA expression (pallas_call fixed cost dominates at
        a handful of rows).  Default 0 so the Pallas path always runs.
    """
    B, In = x.shape
    Out, In_w = weight.shape
    assert In_w == In, "weight must be (output_size, input_size)"

    if B < xla_fallback_batch:
        return jax.nn.sigmoid(x @ weight.T + bias)

    if compute_dtype is not None:
        x = x.astype(compute_dtype)
        weight = weight.astype(compute_dtype)

    # One-time tiny XLA transpose so the kernel matmul is a native [M,K]x[K,N]
    # (no chance of a per-grid-step XLU transpose of the resident weight).
    w_t = weight.T                                  # (In, Out)
    b2 = bias.reshape(1, Out).astype(jnp.float32)   # (1, Out)

    tb = _choose_batch_tile(B, block_b)
    grid_steps = pl.cdiv(B, tb)                     # partial last block allowed:
                                                    # OOB reads masked-in, OOB writes dropped.

    itemsize = jnp.dtype(x.dtype).itemsize
    cost = pl.CostEstimate(
        flops=2 * B * In * Out,
        transcendentals=B * Out,
        bytes_accessed=itemsize * (B * In + In * Out) + 4 * (B * Out + Out),
    )

    kernel = functools.partial(_linear_sigmoid_kernel, approx_recip=approx_sigmoid)

    out = pl.pallas_call(
        kernel,
        out_shape=jax.ShapeDtypeStruct((B, Out), jnp.float32),
        grid=(grid_steps,),
        in_specs=[
            pl.BlockSpec((tb, In), lambda i: (i, 0)),    # x tile per step
            pl.BlockSpec((In, Out), lambda i: (0, 0)),   # weight resident
            pl.BlockSpec((1, Out), lambda i: (0, 0)),    # bias resident
        ],
        out_specs=pl.BlockSpec((tb, Out), lambda i: (i, 0)),  # compact output
        compiler_params=pltpu.CompilerParams(
            # Independent batch tiles -> shard across both TCs on v7x.
            dimension_semantics=("parallel",),
        ),
        cost_estimate=cost,
    )(x, w_t, b2)

    return out


if __name__ == "__main__":
    # Small shapes consistent with the module: batch=8, input_size=32, output_size=16.
    B, INPUT_SIZE, OUTPUT_SIZE = 8, 32, 16

    key = jax.random.PRNGKey(0)
    kx, kw, kb = jax.random.split(key, 3)

    x = jax.random.normal(kx, (B, INPUT_SIZE), dtype=jnp.float32)
    # Deterministic init mimicking nn.Linear's uniform(-1/sqrt(In), 1/sqrt(In)).
    bound = 1.0 / (INPUT_SIZE ** 0.5)
    weight = jax.random.uniform(
        kw, (OUTPUT_SIZE, INPUT_SIZE), minval=-bound, maxval=bound, dtype=jnp.float32
    )
    bias = jax.random.uniform(
        kb, (OUTPUT_SIZE,), minval=-bound, maxval=bound, dtype=jnp.float32
    )

    out = evaluation_model_forward(x, weight, bias)
    jax.block_until_ready(out)

    ref = jax.nn.sigmoid(x @ weight.T + bias)
    assert out.shape == (B, OUTPUT_SIZE)
    assert jnp.allclose(out, ref, atol=1e-5, rtol=1e-5)

    # Tiled path: B=600 with block_b=256 -> 4 even grid steps (tb=152), last
    # block partially out of bounds (no host-side pad, no post-kernel slice).
    B2 = 600
    x2 = jax.random.normal(jax.random.PRNGKey(1), (B2, INPUT_SIZE), dtype=jnp.float32)
    out2 = evaluation_model_forward(x2, weight, bias, block_b=256)
    jax.block_until_ready(out2)
    ref2 = jax.nn.sigmoid(x2 @ weight.T + bias)
    assert out2.shape == (B2, OUTPUT_SIZE)
    assert jnp.allclose(out2, ref2, atol=1e-5, rtol=1e-5)

    # Optional bf16-operand path (halves matmul-operand HBM traffic; f32 accumulate).
    out3 = evaluation_model_forward(x2, weight, bias, compute_dtype=jnp.bfloat16)
    jax.block_until_ready(out3)
    assert out3.shape == (B2, OUTPUT_SIZE)
    assert jnp.allclose(out3, ref2, atol=3e-2, rtol=3e-2)

    print("KERNEL_OK")
</pallas_src>

<mosaic_0001>
module attributes {stable_mosaic.version = 11 : i64} {
  func.func @_linear_sigmoid_kernel(%arg0: i32, %arg1: memref<8x32xf32, #tpu.memory_space<vmem>>, %arg2: memref<32x16xf32, #tpu.memory_space<vmem>>, %arg3: memref<1x16xf32, #tpu.memory_space<vmem>>, %arg4: memref<8x16xf32, #tpu.memory_space<vmem>>) attributes {dimension_semantics = [#tpu.dimension_semantics<parallel>], iteration_bounds = array<i64: 1>, scalar_prefetch = 0 : i64, scratch_operands = 0 : i64, tpu.core_type = #tpu.core_type<tc>, window_params = [{transform_indices = @transform_0, window_bounds = array<i64: 8, 32>}, {pipeline_mode = #tpu.pipeline_mode<synchronous>, transform_indices = @transform_1, window_bounds = array<i64: 32, 16>}, {pipeline_mode = #tpu.pipeline_mode<synchronous>, transform_indices = @transform_2, window_bounds = array<i64: 1, 16>}, {transform_indices = @transform_3, window_bounds = array<i64: 8, 16>}]} {
    %c0 = arith.constant 0 : index
    %c0_0 = arith.constant 0 : index
    %0 = vector.load %arg1[%c0, %c0_0] : memref<8x32xf32, #tpu.memory_space<vmem>>, vector<8x32xf32>
    %c0_1 = arith.constant 0 : index
    %c0_2 = arith.constant 0 : index
    %1 = vector.load %arg2[%c0_1, %c0_2] : memref<32x16xf32, #tpu.memory_space<vmem>>, vector<32x16xf32>
    %cst = arith.constant dense<0.000000e+00> : vector<8x16xf32>
    %2 = tpu.matmul %0, %1, %cst {dimension_numbers = #tpu.dot_dimension_numbers<[1], [0], [0], [1], [0, 0, 1, 1], [], []>} : vector<8x32xf32>, vector<32x16xf32>, vector<8x16xf32> -> vector<8x16xf32>
    %c0_3 = arith.constant 0 : index
    %c0_4 = arith.constant 0 : index
    %3 = vector.load %arg3[%c0_3, %c0_4] : memref<1x16xf32, #tpu.memory_space<vmem>>, vector<1x16xf32>
    %4 = vector.broadcast %3 : vector<1x16xf32> to vector<8x16xf32>
    %5 = arith.addf %2, %4 : vector<8x16xf32>
    %cst_5 = arith.constant 0.000000e+00 : f32
    %6 = vector.broadcast %cst_5 : f32 to vector<8x16xf32>
    %7 = arith.subf %6, %5 : vector<8x16xf32>
    %8 = math.exp %7 : vector<8x16xf32>
    %cst_6 = arith.constant 1.000000e+00 : f32
    %9 = vector.broadcast %cst_6 : f32 to vector<8x16xf32>
    %10 = arith.addf %9, %8 : vector<8x16xf32>
    %11 = tpu.reciprocal %10 : vector<8x16xf32> -> vector<8x16xf32>
    %c0_7 = arith.constant 0 : index
    %c0_8 = arith.constant 0 : index
    %12 = vector.load %arg4[%c0_7, %c0_8] : memref<8x16xf32, #tpu.memory_space<vmem>>, vector<8x16xf32>
    tpu.vector_store %arg4[%c0_7, %c0_8], %11 {strides = array<i32>} : memref<8x16xf32, #tpu.memory_space<vmem>>, vector<8x16xf32>,
    return
  }
  func.func @transform_0(%arg0: i32) -> (i32, i32) {
    %c0_i32 = arith.constant 0 : i32
    %c0_i32_0 = arith.constant 0 : i32
    return %arg0, %c0_i32 : i32, i32
  }
  func.func @transform_1(%arg0: i32) -> (i32, i32) {
    %c0_i32 = arith.constant 0 : i32
    %c0_i32_0 = arith.constant 0 : i32
    %c0_i32_1 = arith.constant 0 : i32
    return %c0_i32, %c0_i32_0 : i32, i32
  }
  func.func @transform_2(%arg0: i32) -> (i32, i32) {
    %c0_i32 = arith.constant 0 : i32
    %c0_i32_0 = arith.constant 0 : i32
    %c0_i32_1 = arith.constant 0 : i32
    return %c0_i32, %c0_i32_0 : i32, i32
  }
  func.func @transform_3(%arg0: i32) -> (i32, i32) {
    %c0_i32 = arith.constant 0 : i32
    %c0_i32_0 = arith.constant 0 : i32
    return %arg0, %c0_i32 : i32, i32
  }
}

</mosaic_0001>

<bundles_post_ra>
// kernel: tpu_custom_call.1
= control target key start
LH: loop header
LB: loop body
LE: loop exit
PB: predicated region body
PF: predicated region fallthrough
CT: control target
= control target key end

     0   :  { %v178_v3 = vmov 0.0|0.0   ;;  %vm179_vm0 = vmmov 0   ;;  %v180_v6 = vmov 0.0   ;;  %s232_s0 = inlined_call_operand.vmem [shape: f32[8,32], index: 0, kind: input, shape index: {}]   ;;  %s233_s1 = inlined_call_operand.vmem [shape: f32[32,16], index: 1, kind: input, shape index: {}]   ;;  %s234_s2 = inlined_call_operand.vmem [shape: f32[1,16], index: 2, kind: input, shape index: {}]   ;;  %s235_s3 = inlined_call_operand.hbm [shape: f32[8,16], index: 3, kind: output, shape index: {}]  }
   0x1   :  { %v16_v0 = vld [vmem:[%s233_s1] sm:$0xff]  ;;  %v17_v1 = vld [vmem:[%s233_s1 + $0x8] sm:$0xff]  ;;  %v18_v2 = vld [vmem:[%s233_s1 + $0x10] sm:$0xff]  ;;  %140 = vmatprep.subr.bf16.mxu0 %v178_v3  ;;  %137 = vmatprep.mubr.msk.f32.mxu0 %vm179_vm0, %v180_v6 }
   0x2   :  { %v141_v4 = vpack.c.bf16 %v17_v1, %v16_v0  ;;  %v19_v5 = vld [vmem:[%s233_s1 + $0x18] sm:$0xff] }
   0x3   :  { %8 = vsyncpa [#allocation3], 0  ;;  %v144_v7 = vpack.c.bf16 %v19_v5, %v18_v2  ;;  %v15_v8 = vld [vmem:[%s232_s0] sm:$0xff]  ;;  %vm27_vm1 = vcmask 261120   ;;  %s181_s1 = smov [#allocation2]   ;;  %vm106_vm2 = vcmask 130048  }
   0x4   :  { %142 = vmatpush3.bf16.msra.mxu0 %v141_v4  ;;  %v122_v9 = vld [vmem:[%s234_s2] ss:$0 sm:$0xff]  ;;  %s114_s24 = sshll.u32 %s181_s1, 4  ;;  %s115_s24 = int_to_ptr.vmem [resolvable:$true] %s114_s24 }
   0x5   :  { %143 = vmatprep.subr.bf16.mxu0 %v178_v3  ;;  %s154_s0 = scalar_lea.vmem %s115_s24, 128  ;;  %p159_p1 = scmp.lt.s32.totalorder %s115_s24, %s115_s24 }
   0x6   :  { %p155_p0 = scmp.ne.s32.totalorder %s115_s24, %s154_s0  ;;  %p160_p2 = scmp.lt.s32.totalorder %s154_s0, %s154_s0 }
   0x8   :  { %145 = vmatpush3.bf16.msra.mxu0 %v144_v7  ;;  %p161_p3 = por %p160_p2, %p159_p1 }
   0xa   :  { %p162_p4 = pnand %p161_p3, %p155_p0 }
   0xb   :  { %138 = vmatmul.mubr.msk.f32.vlgmr.msra.gmra.mrb[0].mxu0 %vm27_vm1, %v15_v8 }
  0xde   :  { %v97_v10 = vpop.f32.mrb[0].mxu0 }
  0xdf   :  { %v98_v11 = vadd.f32 %v122_v9, %v97_v10  ;;  %v139_v12 = vpop.f32.mrb[1].mxu0 }
  0xe1   :  { %v101_v13 = vsub.f32 0.0, %v98_v11 }
  0xe3   :  { %v102_v14 = vmul.f32 1.442695, %v101_v13 }
  0xe5   :  { %150 = vpow2.f32 %v102_v14 }
  0xef   :  { %v151_v15 = vpop.eup %150 }
  0xf0   :  { %v104_v16 = vadd.f32 1.0, %v151_v15 }
  0xf2   :  { %152 = vrcp.f32 %v104_v16 }
  0xfc   :  { %v153_v17 = vpop.eup %152 }
  0xfd   :  { %107 = vst.msk [vmem:[#allocation2] sm:$0xff] %vm106_vm2, %v153_v17 }
  0xfe   :  { %165 = shalt.err (!%p162_p4)
}
  0xff   :  { %s166_s26 = scalar_lea.hbm %s235_s3, 128 }
 0x100   :  { %p167_p5 = scmp.ne.s32.totalorder %s235_s3, %s166_s26  ;;  %p170_p6 = scmp.lt.u32.totalorder %s166_s26, %s235_s3 }
 0x102   :  { %p172_p7 = pnand %p170_p6, %p167_p5 }
 0x104   :  { %175 = shalt.err (!%p172_p7)
}
 0x105   :  { %117 = dma.vmem_to_hbm [thread:$0]  %s115_s24, 128, %s235_s3, [#allocation3]  }
 0x106   :  { %176 = dma.done.wait [#allocation3], 128  }
 0x107   :  { %177 = vsyncadd [#allocation3], 4294967168 }
 0x108   :  { %121 = vsyncpa [#allocation3], 1 }

</bundles_post_ra>
